<compile_context>
chip_gen: v6e
topology: v6e:2x2x1
jax: 0.10.0
libtpu: 0.0.40
codegen_flags: <defaults>
</compile_context>

<pallas_src>
import functools
import math

import jax
import jax.numpy as jnp
from jax.experimental import pallas as pl
from jax.experimental.pallas import tpu as pltpu


def _round_up(x, m):
    return (x + m - 1) // m * m


# ---------------------------------------------------------------------------
# Pallas kernel 1: fused  out = act((A @ W) * scale + bias)
#   single K step, bf16 operands, f32 accumulation & epilogue
# ---------------------------------------------------------------------------
def _mm_kernel(a_ref, b_ref, s_ref, c_ref, o_ref, *, act):
    y = jnp.dot(a_ref[...], b_ref[...], preferred_element_type=jnp.float32)
    y = y * s_ref[...] + c_ref[...]
    if act == "relu":
        y = jnp.maximum(y, 0.0)
    elif act == "sigmoid":
        y = jax.nn.sigmoid(y)
    o_ref[...] = y.astype(o_ref.dtype)


def matmul_fused(a, wp, act="none"):
    """out = act((a @ W) * scale + bias).

    `wp` holds the pre-padded bf16 weight (Kp, Np), f32 scale/bias rows (1, Np)
    and the true output width `n` (all built once at parameter-setup time)."""
    M, K = a.shape
    Kp, Np = wp["w"].shape
    if M > 128:
        Mp, tm = _round_up(M, 128), 128
    else:
        Mp = _round_up(max(M, 8), 16)
        tm = Mp
    tn = 256 if (Np >= 256 and Np % 256 == 0) else 128

    a_p = jnp.pad(a.astype(jnp.float32), ((0, Mp - M), (0, Kp - K))).astype(jnp.bfloat16)

    grid = (Mp // tm, Np // tn)
    out = pl.pallas_call(
        functools.partial(_mm_kernel, act=act),
        out_shape=jax.ShapeDtypeStruct((Mp, Np), jnp.float32),
        grid_spec=pltpu.PrefetchScalarGridSpec(
            num_scalar_prefetch=0,
            grid=grid,
            in_specs=[
                pl.BlockSpec((tm, Kp), lambda i, j: (i, 0)),
                pl.BlockSpec((Kp, tn), lambda i, j: (0, j)),
                pl.BlockSpec((1, tn), lambda i, j: (0, j)),
                pl.BlockSpec((1, tn), lambda i, j: (0, j)),
            ],
            out_specs=pl.BlockSpec((tm, tn), lambda i, j: (i, j)),
        ),
        compiler_params=pltpu.CompilerParams(
            dimension_semantics=("parallel", "parallel"),
            vmem_limit_bytes=48 * 1024 * 1024),
    )(a_p, wp["w"], wp["s"], wp["c"])
    return out[:M, :wp["n"]]


# ---------------------------------------------------------------------------
# Pallas kernel 2: fused 3-layer GCN bottleneck (GCNConv = A_hat @ (X @ W^T) + b)
# Dropout(p=0.5) between layers is identity in eval mode.
# ---------------------------------------------------------------------------
def _gcn_kernel(x_ref, a_ref, w1_ref, b1_ref, w2_ref, b2_ref, w3_ref, b3_ref, o_ref):
    A = a_ref[...]
    h = jnp.dot(x_ref[...], w1_ref[...], preferred_element_type=jnp.float32)
    h = jnp.maximum(jnp.dot(A, h, preferred_element_type=jnp.float32) + b1_ref[...], 0.0)
    h = jnp.dot(h, w2_ref[...], preferred_element_type=jnp.float32)
    h = jnp.maximum(jnp.dot(A, h, preferred_element_type=jnp.float32) + b2_ref[...], 0.0)
    h = jnp.dot(h, w3_ref[...], preferred_element_type=jnp.float32)
    o_ref[...] = (jnp.dot(A, h, preferred_element_type=jnp.float32)
                  + b3_ref[...]).astype(o_ref.dtype)


def gcn_bottleneck(nodes, A_norm, gp):
    def full_spec(arr):
        nd = arr.ndim
        return pl.BlockSpec(arr.shape, lambda i, _nd=nd: (0,) * _nd)

    args = (nodes, A_norm, gp["w1"], gp["b1"], gp["w2"], gp["b2"], gp["w3"], gp["b3"])
    return pl.pallas_call(
        _gcn_kernel,
        out_shape=jax.ShapeDtypeStruct(nodes.shape, jnp.float32),
        grid=(1,),
        in_specs=[full_spec(a) for a in args],
        out_specs=pl.BlockSpec(nodes.shape, lambda i: (0, 0)),
    )(*args)


# ---------------------------------------------------------------------------
# Parameter setup: weights pre-transposed / BN-folded / padded / bf16 ONCE
# ---------------------------------------------------------------------------
def bn_fold(gamma, beta, mean, var, eps=1e-5):
    scale = gamma / jnp.sqrt(var + eps)
    shift = beta - mean * scale
    return scale, shift


def make_mm_weights(wmat, scale, bias):
    K, N = wmat.shape
    Kp, Np = _round_up(K, 128), _round_up(N, 128)
    return dict(
        w=jnp.pad(wmat.astype(jnp.float32), ((0, Kp - K), (0, Np - N))).astype(jnp.bfloat16),
        s=jnp.pad(scale.astype(jnp.float32).reshape(1, N), ((0, 0), (0, Np - N))),
        c=jnp.pad(bias.astype(jnp.float32).reshape(1, N), ((0, 0), (0, Np - N))),
        n=N,
    )


def init_params(key):
    keys = iter(jax.random.split(key, 64))

    def nrm(shape, fan_in):
        return jax.random.normal(next(keys), shape, jnp.float32) * math.sqrt(2.0 / fan_in)

    def conv_prep(cin, cout):
        w = nrm((cout, cin, 3, 3), cin * 9)                 # PyTorch Conv2d layout
        b = jnp.zeros((cout,))
        scale, shift = bn_fold(jnp.ones((cout,)), jnp.zeros((cout,)),
                               jnp.zeros((cout,)), jnp.ones((cout,)))
        wmat = w.transpose(2, 3, 1, 0).reshape(9 * cin, cout)  # rows: (kh, kw, cin)
        return make_mm_weights(wmat, scale, b * scale + shift)

    def dconv(cin, cout):
        return dict(c1=conv_prep(cin, cout), c2=conv_prep(cout, cout))

    def upconv_prep(cin, cout):
        w = nrm((cin, cout, 2, 2), cin * 4)                 # PyTorch ConvTranspose2d layout
        b = jnp.zeros((cout,))
        wmat = w.transpose(0, 2, 3, 1).reshape(cin, 4 * cout)  # cols: (kh, kw, cout)
        return make_mm_weights(wmat, jnp.ones((4 * cout,)), jnp.tile(b, 4))

    gcn_w1, gcn_b1 = nrm((32, 512), 512), jnp.zeros((32,))
    gcn_w2, gcn_b2 = nrm((32, 32), 32), jnp.zeros((32,))
    gcn_w3, gcn_b3 = nrm((512, 32), 32), jnp.zeros((512,))
    w_out = nrm((1, 64, 1, 1), 64)

    return dict(
        inc=dconv(1, 64),
        down1=dconv(64, 128),
        down2=dconv(128, 256),
        down3=dconv(256, 512),
        gcn=dict(w1=gcn_w1.T, b1=gcn_b1.reshape(1, -1),
                 w2=gcn_w2.T, b2=gcn_b2.reshape(1, -1),
                 w3=gcn_w3.T, b3=gcn_b3.reshape(1, -1)),
        up1=dict(ct=upconv_prep(512, 256), dc=dconv(512, 256)),
        up2=dict(ct=upconv_prep(256, 128), dc=dconv(256, 128)),
        up3=dict(ct=upconv_prep(128, 64), dc=dconv(128, 64)),
        outc=make_mm_weights(w_out.reshape(1, 64).T, jnp.ones((1,)), jnp.zeros((1,))),
    )


# ---------------------------------------------------------------------------
# Building blocks (NHWC activations; Pallas matmuls + thin XLA glue)
# ---------------------------------------------------------------------------
def conv3x3(x, wp, relu=True):
    """3x3 conv, padding=1, fused BN+bias(+ReLU).  x is NHWC."""
    B, H, W, Cin = x.shape
    xp = jnp.pad(x, ((0, 0), (1, 1), (1, 1), (0, 0)))
    patches = jnp.concatenate(
        [xp[:, kh:kh + H, kw:kw + W, :] for kh in range(3) for kw in range(3)],
        axis=-1)                                            # [B, H, W, 9*Cin], channels-last
    a = patches.reshape(B * H * W, 9 * Cin)
    out = matmul_fused(a, wp, act="relu" if relu else "none")
    return out.reshape(B, H, W, wp["n"])


def double_conv(x, p):
    return conv3x3(conv3x3(x, p["c1"], relu=True), p["c2"], relu=True)


def maxpool2x2(x):
    B, H, W, C = x.shape
    Ho, Wo = H // 2, W // 2
    return x[:, :2 * Ho, :2 * Wo, :].reshape(B, Ho, 2, Wo, 2, C).max(axis=(2, 4))


def conv_transpose2x2(x, wp):
    """ConvTranspose2d(k=2, stride=2) == one fused matmul producing 4 sub-pixel outputs."""
    B, Hi, Wi, Cin = x.shape
    cout = wp["n"] // 4
    y = matmul_fused(x.reshape(B * Hi * Wi, Cin), wp, act="none")
    y = y.reshape(B, Hi, Wi, 2, 2, cout).transpose(0, 1, 3, 2, 4, 5)
    return y.reshape(B, 2 * Hi, 2 * Wi, cout)


def up_block(x1, x2, p):
    y = conv_transpose2x2(x1, p["ct"])
    dY = x2.shape[1] - y.shape[1]
    dX = x2.shape[2] - y.shape[2]
    y = jnp.pad(y, ((0, 0), (dY // 2, dY - dY // 2), (dX // 2, dX - dX // 2), (0, 0)))
    return double_conv(jnp.concatenate([x2, y], axis=-1), p["dc"])


def create_graph_adjacency(key, num_nodes, k_neighbors):
    """Random k-NN graph (as in create_graph) -> dense GCNConv-normalized A_hat."""
    k = min(k_neighbors, num_nodes - 1)
    rv = jax.random.uniform(key, (num_nodes, num_nodes))
    rv = rv - 2.0 * jnp.eye(num_nodes)            # diagonal never selected
    idx = jnp.argsort(-rv, axis=1)[:, :k]         # top-k targets per source node
    A = jnp.zeros((num_nodes, num_nodes))
    src = jnp.arange(num_nodes)[:, None]
    A = A.at[idx, src].set(1.0)                   # edge src -> tgt : A[tgt, src] = 1
    A = A + jnp.eye(num_nodes)                    # GCNConv add_self_loops
    deg = A.sum(axis=1)
    dinv = 1.0 / jnp.sqrt(deg)
    return dinv[:, None] * A * dinv[None, :]


def istft(spec, n_fft, hop, window):
    """torch.istft (center=True, onesided, length=None, hann window) — XLA glue."""
    B, F, T = spec.shape
    frames = jnp.fft.irfft(spec.transpose(0, 2, 1), n=n_fft, axis=-1)   # [B, T, n_fft]
    framed = frames * window[None, None, :]
    wsq_frame = window ** 2
    if n_fft == 2 * hop:
        # 50%-overlap fast path: overlap-add == two shifted half-frame adds.
        zp = jnp.zeros((B, 1, hop), framed.dtype)
        y = (jnp.concatenate([framed[:, :, :hop], zp], axis=1)
             + jnp.concatenate([zp, framed[:, :, hop:]], axis=1)).reshape(B, (T + 1) * hop)
        wz = jnp.zeros((1, hop), jnp.float32)
        wsq = (jnp.concatenate([jnp.broadcast_to(wsq_frame[:hop], (T, hop)), wz], axis=0)
               + jnp.concatenate([wz, jnp.broadcast_to(wsq_frame[hop:], (T, hop))], axis=0)
               ).reshape((T + 1) * hop)
    else:
        # TODO(synk): general-hop overlap-add kept as a scatter-add loop.
        total = n_fft + hop * (T - 1)
        y = jnp.zeros((B, total), jnp.float32)
        wsq = jnp.zeros((total,), jnp.float32)
        for t in range(T):
            y = y.at[:, t * hop:t * hop + n_fft].add(framed[:, t])
            wsq = wsq.at[t * hop:t * hop + n_fft].add(wsq_frame)
    start = n_fft // 2
    length = hop * (T - 1)
    y = y[:, start:start + length]
    wsq = wsq[start:start + length]
    return y / jnp.where(wsq > 1e-11, wsq, 1.0)


# ---------------------------------------------------------------------------
# Full forward pass
# ---------------------------------------------------------------------------
def speq_gcn_net_forward(params, x_magnitude, complex_re, complex_im, graph_key,
                         n_fft=32, hop_length=16, num_node=8):
    # x_magnitude comes in NCHW [B, 1, freq_bins, time_frames] like PyTorch.
    window = 0.5 * (1.0 - jnp.cos(2.0 * jnp.pi *
                                  jnp.arange(n_fft, dtype=jnp.float32) / n_fft))

    x = jnp.transpose(x_magnitude, (0, 2, 3, 1))   # NHWC once; stays NHWC end-to-end
    x1 = double_conv(x, params["inc"])
    x2 = double_conv(maxpool2x2(x1), params["down1"])
    x3 = double_conv(maxpool2x2(x2), params["down2"])
    x4 = double_conv(maxpool2x2(x3), params["down3"])

    Bb, Hb, Wb, Cb = x4.shape
    nodes = x4.reshape(Bb * Hb * Wb, Cb)           # same node order as torch's permute
    A_norm = create_graph_adjacency(graph_key, nodes.shape[0], num_node)
    x4p = gcn_bottleneck(nodes, A_norm, params["gcn"]).reshape(Bb, Hb, Wb, Cb)

    d3 = up_block(x4p, x3, params["up1"])
    d2 = up_block(d3, x2, params["up2"])
    d1 = up_block(d2, x1, params["up3"])

    # outc (1x1 conv) with sigmoid fused in the Pallas matmul epilogue
    Bo, Ho, Wo, Co = d1.shape
    mask = matmul_fused(d1.reshape(Bo * Ho * Wo, Co), params["outc"], act="sigmoid")
    mask = mask.reshape(Bo, Ho, Wo, 1)

    # TODO(synk): F.interpolate bilinear-resize branch not implemented (mask size always
    # equals the input spectrogram size for the shapes used here).
    pred_mag = (x_magnitude * jnp.transpose(mask, (0, 3, 1, 2)))[:, 0]   # n_classes == 1

    phase = jnp.arctan2(complex_im, complex_re)
    rec = jax.lax.complex(pred_mag * jnp.cos(phase), pred_mag * jnp.sin(phase))
    return istft(rec, n_fft, hop_length, window)


# ---------------------------------------------------------------------------
if __name__ == "__main__":
    key = jax.random.PRNGKey(0)
    kp, kc1, kc2, kg = jax.random.split(key, 4)
    params = init_params(kp)

    # Small shapes: n_fft=32 -> 17 freq bins, 16 time frames, batch 2, 1 channel.
    B, Fbins, T = 2, 17, 16
    n_fft, hop = 32, 16
    complex_re = jax.random.normal(kc1, (B, Fbins, T), jnp.float32)
    complex_im = jax.random.normal(kc2, (B, Fbins, T), jnp.float32)
    x_magnitude = jnp.sqrt(complex_re ** 2 + complex_im ** 2)[:, None]   # [B,1,F,T]

    out = speq_gcn_net_forward(params, x_magnitude, complex_re, complex_im, kg,
                               n_fft=n_fft, hop_length=hop, num_node=8)
    out = jax.block_until_ready(out)
    assert out.shape == (B, hop * (T - 1)) and bool(jnp.all(jnp.isfinite(out)))
    print("KERNEL_OK")
</pallas_src>

<mosaic_0001>
module attributes {stable_mosaic.version = 11 : i64} {
  func.func @_mm_kernel(%arg0: i32, %arg1: i32, %arg2: memref<128x128xbf16, #tpu.memory_space<vmem>>, %arg3: memref<128x128xbf16, #tpu.memory_space<vmem>>, %arg4: memref<1x128xf32, #tpu.memory_space<vmem>>, %arg5: memref<1x128xf32, #tpu.memory_space<vmem>>, %arg6: memref<128x128xf32, #tpu.memory_space<vmem>>) attributes {dimension_semantics = [#tpu.dimension_semantics<parallel>, #tpu.dimension_semantics<parallel>], iteration_bounds = array<i64: 5, 1>, scalar_prefetch = 0 : i64, scratch_operands = 0 : i64, tpu.core_type = #tpu.core_type<tc>, window_params = [{transform_indices = @transform_0, window_bounds = array<i64: 128, 128>}, {transform_indices = @transform_1, window_bounds = array<i64: 128, 128>}, {transform_indices = @transform_2, window_bounds = array<i64: 1, 128>}, {transform_indices = @transform_3, window_bounds = array<i64: 1, 128>}, {transform_indices = @transform_4, window_bounds = array<i64: 128, 128>}]} {
    %c0 = arith.constant 0 : index
    %c0_0 = arith.constant 0 : index
    %0 = vector.load %arg2[%c0, %c0_0] : memref<128x128xbf16, #tpu.memory_space<vmem>>, vector<128x128xbf16>
    %c0_1 = arith.constant 0 : index
    %c0_2 = arith.constant 0 : index
    %1 = vector.load %arg3[%c0_1, %c0_2] : memref<128x128xbf16, #tpu.memory_space<vmem>>, vector<128x128xbf16>
    %cst = arith.constant dense<0.000000e+00> : vector<128x128xf32>
    %2 = tpu.matmul %0, %1, %cst {dimension_numbers = #tpu.dot_dimension_numbers<[1], [0], [0], [1], [0, 0, 1, 1], [], []>} : vector<128x128xbf16>, vector<128x128xbf16>, vector<128x128xf32> -> vector<128x128xf32>
    %c0_3 = arith.constant 0 : index
    %c0_4 = arith.constant 0 : index
    %3 = vector.load %arg4[%c0_3, %c0_4] : memref<1x128xf32, #tpu.memory_space<vmem>>, vector<1x128xf32>
    %4 = vector.broadcast %3 : vector<1x128xf32> to vector<128x128xf32>
    %5 = arith.mulf %2, %4 : vector<128x128xf32>
    %c0_5 = arith.constant 0 : index
    %c0_6 = arith.constant 0 : index
    %6 = vector.load %arg5[%c0_5, %c0_6] : memref<1x128xf32, #tpu.memory_space<vmem>>, vector<1x128xf32>
    %7 = vector.broadcast %6 : vector<1x128xf32> to vector<128x128xf32>
    %8 = arith.addf %5, %7 : vector<128x128xf32>
    %cst_7 = arith.constant 0.000000e+00 : f32
    %9 = vector.broadcast %cst_7 : f32 to vector<128x128xf32>
    %10 = arith.maximumf %8, %9 : vector<128x128xf32>
    %c0_8 = arith.constant 0 : index
    %c0_9 = arith.constant 0 : index
    %11 = vector.load %arg6[%c0_8, %c0_9] : memref<128x128xf32, #tpu.memory_space<vmem>>, vector<128x128xf32>
    tpu.vector_store %arg6[%c0_8, %c0_9], %10 {strides = array<i32>} : memref<128x128xf32, #tpu.memory_space<vmem>>, vector<128x128xf32>,
    return
  }
  func.func @transform_0(%arg0: i32, %arg1: i32) -> (i32, i32) {
    %c0_i32 = arith.constant 0 : i32
    %c0_i32_0 = arith.constant 0 : i32
    return %arg0, %c0_i32 : i32, i32
  }
  func.func @transform_1(%arg0: i32, %arg1: i32) -> (i32, i32) {
    %c0_i32 = arith.constant 0 : i32
    %c0_i32_0 = arith.constant 0 : i32
    return %c0_i32, %arg1 : i32, i32
  }
  func.func @transform_2(%arg0: i32, %arg1: i32) -> (i32, i32) {
    %c0_i32 = arith.constant 0 : i32
    %c0_i32_0 = arith.constant 0 : i32
    return %c0_i32, %arg1 : i32, i32
  }
  func.func @transform_3(%arg0: i32, %arg1: i32) -> (i32, i32) {
    %c0_i32 = arith.constant 0 : i32
    %c0_i32_0 = arith.constant 0 : i32
    return %c0_i32, %arg1 : i32, i32
  }
  func.func @transform_4(%arg0: i32, %arg1: i32) -> (i32, i32) {
    %c0_i32 = arith.constant 0 : i32
    return %arg0, %arg1 : i32, i32
  }
}

</mosaic_0001>

<bundles_post_ra>
// kernel: tpu_custom_call.1
= control target key start
LH: loop header
LB: loop body
LE: loop exit
PB: predicated region body
PF: predicated region fallthrough
CT: control target
= control target key end

     0   :  { %s1345_s0 = inlined_call_operand.hbm [shape: bf16[640,128], index: 0, kind: input, shape index: {}]   ;;  %s1346_s1 = inlined_call_operand.hbm [shape: bf16[128,128], index: 1, kind: input, shape index: {}]   ;;  %s1347_s2 = inlined_call_operand.vmem [shape: f32[1,128], index: 2, kind: input, shape index: {}]   ;;  %s1348_s3 = inlined_call_operand.vmem [shape: f32[1,128], index: 3, kind: input, shape index: {}]   ;;  %s1349_s4 = inlined_call_operand.hbm [shape: f32[640,128], index: 4, kind: output, shape index: {}]  }
   0x1   :  { %1353 = sst [smem:[#allocation11_spill]] %s1346_s1 }
   0x2   :  { %9 = vsyncpa [#allocation3], 0 }
   0x3   :  { %11 = vsyncpa [#allocation3 + $0x1], 0 }
   0x4   :  { %12 = vsyncpa [#allocation6], 0 }
   0x5   :  { %13 = vsyncpa [#allocation4], 0 }
   0x6   :  { %15 = vsyncpa [#allocation4 + $0x1], 0  ;;  %s1088_s15 = smov 0   ;;  %s1090_s16 = smov 0  }
   0x7   :  { %s1092_s17 = smov 0   ;;  %s1094_s18 = smov 0  }
   0x8   :  { %s1096_s19 = smov 0   ;;  %s1098_s20 = smov 0  }
   0x9 LB: > { %s720_s21 = sadd.s32 4294967295, %s1054_s20   ;;  %s721_s22 = sadd.s32 4294967294, %s1054_s20   ;;  %s1054_s20 = sphi %s1098_s20, %s21_s20   ;;  %s1050_s19 = sphi %s1096_s19, %s1372_s19   ;;  %s1046_s18 = sphi %s1094_s18, %s1371_s18   ;;  %s1042_s17 = sphi %s1092_s17, %s1370_s17   ;;  %s1038_s16 = sphi %s1090_s16, %s1369_s16   ;;  %s1034_s15 = sphi %s1088_s15, %s1368_s15  }
   0xa   : > { %p53_p0 = scmp.ne.s32.totalorder %s1038_s16, %s1034_s15  ;;  %p1122_p1 = scmp.eq.s32.totalorder %s720_s21, 0 }
   0xb   : > { %p1126_p2 = scmp.eq.s32.totalorder %s720_s21, 4  ;;  %p163_p3 = scmp.eq.s32.totalorder %s721_s22, 4 }
   0xc   : > { %p1132_p4 = por %p1122_p1, %p53_p0  ;;  %p722_p5 = scmp.ge.s32.totalorder %s1054_s20, 1 }
   0xd   : > { %p1137_p6 = por %p163_p3, %p53_p0  ;;  %p170_p7 = scmp.lt.s32.totalorder %s1054_s20, 6 }
   0xe   : > { %s1056_s28 = smov [#allocation5]   ;;  %s33_s5 = sadd.s32 1, %s1050_s19 }
   0xf   : > { %s1357_s26 = scalar_select %p1137_p6, 1, 0 }
  0x10   : > { %p1142_p8 = pnand %p722_p5, %p170_p7  ;;  %s184_s29 = sshll.u32 %s1056_s28, 4  ;;  %s185_s29 = int_to_ptr.vmem [resolvable:$true] %s184_s29 }
  0x11   : > { %s927_s6 = scalar_lea.vmem %s185_s29, 1024  ;;  %p935_p3 = scmp.lt.s32.totalorder %s185_s29, %s185_s29 }
  0x12   : > { %p831_p9 = pneg %p1142_p8  ;;  %p928_p12 = scmp.ne.s32.totalorder %s185_s29, %s927_s6 }
  0x13   : > { %p936_p5 = scmp.lt.s32.totalorder %s927_s6, %s927_s6 }
  0x14   : > { %p1150_p10 = pnand %p831_p9, %p1122_p1 }
  0x15   : > { %p937_p7 = por %p936_p5, %p935_p3 }
  0x16   : > { %p918_p11 = pneg %p1150_p10 }
  0x18   : > { %p930_p13 = pnand %p928_p12, %p918_p11 }
  0x1a   : > { %p931_p0 = pneg %p930_p13 }
  0x1c   : > { %p938_p6 = pnand %p937_p7, %p931_p0 }
  0x1e   : > { %941 = shalt.err (!%p938_p6)
}
  0x1f   : > { %s1350_s7 = smov 64   ;;  %s1351_s8 = smov 4  }
  0x20   : > { %s1360_s1 = sld [smem:[#allocation11_spill]]  ;;  %p35_p6 = scmp.ge.s32.totalorder %s33_s5, 5 }
  0x21   : > { %s40_s11 = sadd.s32 1, %s1042_s17  ;;  %p47_p9 = scmp.ne.s32.totalorder %s1042_s17, %s1038_s16 }
  0x22   : > { %p48_p11 = scmp.eq.s32.totalorder %s1054_s20, 0  ;;  %s1374_s5 = smov (%p35_p6, %s33_s5), 0 }
  0x23   : > { %p1177_p13 = por %p1126_p2, %p47_p9  ;;  %s37_s14 = ssub.s32 %s1050_s19, %s1374_s5 }
  0x24   : > { %p1171_p12 = por %p48_p11, %p47_p9  ;;  %p844_p0 = scmp.lt.s32.totalorder %s1054_s20, 5 }
  0x25   : > { %s1362_s13 = scalar_select %p1177_p13, 1, 0 }
  0x26   : > { %834 = dma.hbm_to_vmem [thread:$0]  (!%p1150_p10), %s1360_s1, 1024, %s185_s29, [#allocation6], %s1350_s7, %s1350_s7, %s1351_s8  }
  0x27   : > { %p38_p10 = scmp.eq.s32.totalorder %s37_s14, 0  ;;  %s210_s21 = sand.u32 1, %s1042_s17  }
  0x28   : > { %s727_s22 = sshll.u32 %s210_s21, 6  ;;  %s757_s29 = sshll.u32 %s1050_s19, 10 }
  0x29   : > { %s1186_s28 = scalar_select %p38_p10, %s1042_s17, %s40_s11  }
  0x2a   : > { %s220_s9 = scalar_lea.hbm %s1345_s0, %s757_s29  ;;  %s214_s10 = scalar_lea.vmem [#allocation2], %s727_s22 }
  0x2b   : > { %s221_s7 = sshll.u32 %s214_s10, 4  ;;  %p1194_p2 = pnand %p844_p0, %p1171_p12  ;;  %s222_s7 = int_to_ptr.vmem [resolvable:$true] %s221_s7 }
  0x2c   : > { %s211_s8 = scalar_lea.sflag [#allocation3], %s210_s21  ;;  %s955_s14 = scalar_lea.vmem %s222_s7, 1024 }
  0x2d   : > { %p944_p3 = pneg %p1194_p2  ;;  %p956_p5 = scmp.ne.s32.totalorder %s222_s7, %s955_s14 }
  0x2e   : > { %s1059_s11 = smov [#allocation2]  }
  0x2f   : > { %p958_p7 = pnand %p956_p5, %p944_p3  ;;  %s960_s1 = sshll.u32 %s1059_s11, 4  ;;  %s961_s1 = int_to_ptr.vmem [resolvable:$false] %s960_s1 }
  0x30   : > { %s962_s29 = scalar_lea.vmem %s961_s1, 2048  ;;  %p963_p9 = scmp.lt.s32.totalorder %s222_s7, %s961_s1 }
  0x31   : > { %p959_p6 = pneg %p958_p7  ;;  %p964_p11 = scmp.lt.s32.totalorder %s962_s29, %s955_s14 }
  0x33   : > { %p965_p10 = por %p964_p11, %p963_p9 }
  0x35   : > { %p966_p13 = pnand %p965_p10, %p959_p6 }
  0x37   : > { %969 = shalt.err (!%p966_p13)
}
  0x38   : > { %s1364_s12 = smov 4   ;;  %s1365_s22 = smov 64  }
  0x39   : > { %838 = dma.hbm_to_vmem [thread:$0]  (!%p1194_p2), %s220_s9, 1024, %s222_s7, %s211_s8, %s1365_s22, %s1365_s22, %s1364_s12  }
  0x3a   : > { %233 = sbr.rel (%p1142_p8) target bundleno = 326 (0x146), region = 36  ;;  %s1208_s21 = sand.u32 (!%p1142_p8), 1, %s1038_s16  }
  0x3b   : > { %s731_s1 = sshll.u32 (!%p1142_p8), %s1208_s21, 6  ;;  %s236_s30 = scalar_lea.sflag (!%p1142_p8), [#allocation3], %s1208_s21 }
  0x3c   : > { %s1212_s6 = scalar_lea.vmem (!%p1142_p8), [#allocation2], %s731_s1 }
  0x3f   : > { %1021 = dma.done.wait (%p1132_p4), %s236_s30, 1024  }
  0x40   : > { %1023 = vsyncadd (%p1132_p4), %s236_s30, 4294966272 }
  0x41   : > { %1025 = dma.done.wait (%p1122_p1), [#allocation6], 1024  }
  0x42   : > { %1027 = vsyncadd (%p1122_p1), [#allocation6], 4294966272  ;;  %v900_v0 = vld [vmem:[#allocation5 + $0x38] sm:$0xff]   ;;  %v901_v1 = vld [vmem:[#allocation5 + $0x30] sm:$0xff]   ;;  %s733_s8 = sshll.u32 %s1208_s21, 7  ;;  %s758_s10 = sshll.u32 %s1046_s18, 11 }
  0x43   : > { %775 = vmatprep.subr.bf16.mxu0 %v900_v0  ;;  %807 = vmatprep.subr.bf16.mxu1 %v900_v0  ;;  %v902_v2 = vld [vmem:[#allocation5 + $0x28] sm:$0xff]   ;;  %v903_v3 = vld [vmem:[#allocation5 + $0x20] sm:$0xff]   ;;  %v904_v6 = vld [vmem:[#allocation5 + $0x18] sm:$0xff]   ;;  %s1251_s9 = scalar_lea.vmem [#allocation7], %s733_s8  ;;  %s1292_s29 = scalar_lea.hbm %s1349_s4, %s758_s10 }
  0x44   : > { %776 = vmatpush3.bf16.msra.mxu0 %v900_v0  ;;  %815 = vmatpush3.bf16.msra.mxu1 %v900_v0  ;;  %v908_v4 = vld [vmem:[%s1212_s6] sm:$0xff]   ;;  %v905_v7 = vld [vmem:[#allocation5 + $0x10] sm:$0xff]   ;;  %v906_v8 = vld [vmem:[#allocation5 + $0x8] sm:$0xff]   ;;  %s601_s24 = sshll.u32 %s1251_s9, 4  ;;  %s587_s18 = scalar_lea.sflag [#allocation4], %s1208_s21  ;;  %s1294_s24 = int_to_ptr.vmem [resolvable:$true] %s601_s24 }
  0x45   : > { %777 = vmatprep.subr.bf16.mxu0 %v901_v1  ;;  %808 = vmatprep.subr.bf16.mxu1 %v901_v1  ;;  %v909_v5 = vld [vmem:[%s1212_s6 + $0x20] sm:$0xff]   ;;  %v910_v10 = vld [vmem:[%s1212_s6 + $0x8] sm:$0xff]   ;;  %v912_v12 = vld [vmem:[%s1212_s6 + $0x10] sm:$0xff]   ;;  %s970_s12 = scalar_lea.vmem %s1294_s24, 2048  ;;  %p1366_p4 = scmp.ne.s32.totalorder %s1362_s13, 0 }
  0x46   : > { %791 = vmatprep.mubr.bf16.mxu0 %v908_v4  ;;  %799 = vmatprep.mubr.bf16.mxu1 %v909_v5  ;;  %v907_v9 = vld [vmem:[#allocation5] sm:$0xff]   ;;  %v911_v11 = vld [vmem:[%s1212_s6 + $0x28] sm:$0xff]   ;;  %v913_v13 = vld [vmem:[%s1212_s6 + $0x30] sm:$0xff]   ;;  %p971_p1 = scmp.ne.s32.totalorder %s1294_s24, %s970_s12  ;;  %s1060_s22 = smov [#allocation7]  }
  0x47   : > { %v914_v14 = vld [vmem:[%s1212_s6 + $0x18] sm:$0xff]   ;;  %v1233_v16 = vld [vmem:[%s1347_s2] ss:$0 sm:$0xff]  ;;  %s974_s1 = sshll.u32 %s1060_s22, 4  ;;  %s975_s1 = int_to_ptr.vmem [resolvable:$false] %s974_s1 }
  0x48   : > { %778 = vmatpush3.bf16.msra.mxu0 %v901_v1  ;;  %816 = vmatpush3.bf16.msra.mxu1 %v901_v1  ;;  %v915_v15 = vld [vmem:[%s1212_s6 + $0x38] sm:$0xff]   ;;  %v1238_v18 = vld [vmem:[%s1348_s3] ss:$0 sm:$0xff]  ;;  %p972_p8 = pnand %p971_p1, %p1366_p4  ;;  %s976_s30 = scalar_lea.vmem %s975_s1, 4096 }
  0x49   : > { %779 = vmatprep.subr.bf16.mxu0 %v902_v2  ;;  %809 = vmatprep.subr.bf16.mxu1 %v902_v2  ;;  %p977_p13 = scmp.lt.s32.totalorder %s1294_s24, %s975_s1  ;;  %p978_p0 = scmp.lt.s32.totalorder %s976_s30, %s970_s12 }
  0x4a   : > { %p973_p12 = pneg %p972_p8 }
  0x4b   : > { %p979_p2 = por %p978_p0, %p977_p13 }
  0x4c   : > { %780 = vmatpush3.bf16.msra.mxu0 %v902_v2  ;;  %817 = vmatpush3.bf16.msra.mxu1 %v902_v2 }
  0x4d   : > { %781 = vmatprep.subr.bf16.mxu0 %v903_v3  ;;  %810 = vmatprep.subr.bf16.mxu1 %v903_v3  ;;  %p980_p3 = pnand %p979_p2, %p973_p12 }
  0x50   : > { %782 = vmatpush3.bf16.msra.mxu0 %v903_v3  ;;  %818 = vmatpush3.bf16.msra.mxu1 %v903_v3 }
  0x51   : > { %783 = vmatprep.subr.bf16.mxu0 %v904_v6  ;;  %811 = vmatprep.subr.bf16.mxu1 %v904_v6 }
  0x54   : > { %784 = vmatpush3.bf16.msra.mxu0 %v904_v6  ;;  %819 = vmatpush3.bf16.msra.mxu1 %v904_v6 }
  0x55   : > { %785 = vmatprep.subr.bf16.mxu0 %v905_v7  ;;  %812 = vmatprep.subr.bf16.mxu1 %v905_v7 }
  0x58   : > { %786 = vmatpush3.bf16.msra.mxu0 %v905_v7  ;;  %820 = vmatpush3.bf16.msra.mxu1 %v905_v7 }
  0x59   : > { %787 = vmatprep.subr.bf16.mxu0 %v906_v8  ;;  %813 = vmatprep.subr.bf16.mxu1 %v906_v8 }
  0x5c   : > { %788 = vmatpush3.bf16.msra.mxu0 %v906_v8  ;;  %821 = vmatpush3.bf16.msra.mxu1 %v906_v8 }
  0x5d   : > { %789 = vmatprep.subr.bf16.mxu0 %v907_v9  ;;  %814 = vmatprep.subr.bf16.mxu1 %v907_v9 }
  0x60   : > { %790 = vmatpush3.bf16.msra.mxu0 %v907_v9  ;;  %822 = vmatpush3.bf16.msra.mxu1 %v907_v9 }
  0x63   : > { %792 = vmatmul.mubr.bf16.vlgmr.msra.gmra.mxu0 %v910_v10  ;;  %800 = vmatmul.mubr.bf16.vlgmr.msra.gmra.mxu1 %v911_v11 }
  0x64   : > { %795 = vmatprep.mubr.bf16.mxu0 %v912_v12  ;;  %803 = vmatprep.mubr.bf16.mxu1 %v913_v13 }
  0x6b   : > { %796 = vmatmul.mubr.bf16.gmra.mxu0 %v914_v14  ;;  %804 = vmatmul.mubr.bf16.gmra.mxu1 %v915_v15 }
 0x123   : > { %v793_v17 = vpop.f32.mrf.mxu0  ;;  %v801_v19 = vpop.f32.mrf.mxu1 }
 0x124   : > { %v517_v20 = vmul.f32 %v793_v17, %v1233_v16  ;;  %v525_v21 = vmul.f32 %v801_v19, %v1233_v16 }
 0x125   : > { %v445_v22 = vpop.f32.mrf.mxu0  ;;  %v477_v23 = vpop.f32.mrf.mxu1 }
 0x126   : > { %v540_v24 = vadd.f32 %v1238_v18, %v517_v20  ;;  %v548_v25 = vadd.f32 %v1238_v18, %v525_v21  ;;  %v515_v26 = vmul.f32 %v1233_v16, %v445_v22  ;;  %v523_v27 = vmul.f32 %v1233_v16, %v477_v23 }
 0x127   : > { %v794_v28 = vpop.f32.mrf.mxu0  ;;  %v802_v29 = vpop.f32.mrf.mxu1 }
 0x128   : > { %v556_v30 = vmax.f32 %v540_v24, 0.0  ;;  %v564_v31 = vmax.f32 %v548_v25, 0.0  ;;  %v538_v32 = vadd.f32 %v1238_v18, %v515_v26  ;;  %v546_v33 = vadd.f32 %v1238_v18, %v523_v27 }
 0x129   : > { %v518_v34 = vmul.f32 %v794_v28, %v1233_v16  ;;  %v526_v35 = vmul.f32 %v802_v29, %v1233_v16  ;;  %v448_v36 = vpop.f32.mrf.mxu0  ;;  %v480_v37 = vpop.f32.mrf.mxu1 }
 0x12a   : > { %572 = vst [vmem:[%s1251_s9 + $0x10] sm:$0xff] %v556_v30  ;;  %580 = vst [vmem:[%s1251_s9 + $0x50] sm:$0xff] %v564_v31  ;;  %v554_v38 = vmax.f32 %v538_v32, 0.0  ;;  %v562_v39 = vmax.f32 %v546_v33, 0.0  ;;  %v516_v40 = vmul.f32 %v1233_v16, %v448_v36  ;;  %v524_v41 = vmul.f32 %v1233_v16, %v480_v37 }
 0x12b   : > { %v541_v42 = vadd.f32 %v1238_v18, %v518_v34  ;;  %v549_v43 = vadd.f32 %v1238_v18, %v526_v35  ;;  %v797_v44 = vpop.f32.mrf.mxu0  ;;  %v805_v45 = vpop.f32.mrf.mxu1 }
 0x12c   : > { %570 = vst [vmem:[%s1251_s9] sm:$0xff] %v554_v38  ;;  %578 = vst [vmem:[%s1251_s9 + $0x40] sm:$0xff] %v562_v39  ;;  %v539_v46 = vadd.f32 %v1238_v18, %v516_v40  ;;  %v547_v47 = vadd.f32 %v1238_v18, %v524_v41  ;;  %v521_v48 = vmul.f32 %v797_v44, %v1233_v16 }
 0x12d   : > { %v529_v49 = vmul.f32 %v805_v45, %v1233_v16  ;;  %v557_v50 = vmax.f32 %v541_v42, 0.0  ;;  %v565_v51 = vmax.f32 %v549_v43, 0.0  ;;  %v461_v52 = vpop.f32.mrf.mxu0  ;;  %v493_v53 = vpop.f32.mrf.mxu1 }
 0x12e   : > { %v555_v54 = vmax.f32 %v539_v46, 0.0  ;;  %v563_v55 = vmax.f32 %v547_v47, 0.0  ;;  %v544_v56 = vadd.f32 %v1238_v18, %v521_v48  ;;  %v519_v58 = vmul.f32 %v1233_v16, %v461_v52 }
 0x12f   : > { %v552_v57 = vadd.f32 %v1238_v18, %v529_v49  ;;  %573 = vst [vmem:[%s1251_s9 + $0x18] sm:$0xff] %v557_v50  ;;  %581 = vst [vmem:[%s1251_s9 + $0x58] sm:$0xff] %v565_v51  ;;  %v527_v59 = vmul.f32 %v1233_v16, %v493_v53  ;;  %v798_v60 = vpop.f32.mrf.mxu0  ;;  %v806_v61 = vpop.f32.mrf.mxu1 }
 0x130   : > { %571 = vst [vmem:[%s1251_s9 + $0x8] sm:$0xff] %v555_v54  ;;  %579 = vst [vmem:[%s1251_s9 + $0x48] sm:$0xff] %v563_v55  ;;  %v560_v62 = vmax.f32 %v544_v56, 0.0  ;;  %v522_v0 = vmul.f32 %v798_v60, %v1233_v16  ;;  %v530_v1 = vmul.f32 %v806_v61, %v1233_v16  ;;  %v542_v2 = vadd.f32 %v1238_v18, %v519_v58 }
 0x131   : > { %v568_v63 = vmax.f32 %v552_v57, 0.0  ;;  %v550_v3 = vadd.f32 %v1238_v18, %v527_v59  ;;  %v464_v4 = vpop.f32.mrf.mxu0  ;;  %v496_v5 = vpop.f32.mrf.mxu1 }
 0x132   : > { %576 = vst [vmem:[%s1251_s9 + $0x30] sm:$0xff] %v560_v62  ;;  %v545_v6 = vadd.f32 %v1238_v18, %v522_v0  ;;  %v553_v7 = vadd.f32 %v1238_v18, %v530_v1  ;;  %v520_v8 = vmul.f32 %v1233_v16, %v464_v4  ;;  %v528_v9 = vmul.f32 %v1233_v16, %v496_v5 }
 0x133   : > { %584 = vst [vmem:[%s1251_s9 + $0x70] sm:$0xff] %v568_v63  ;;  %v558_v10 = vmax.f32 %v542_v2, 0.0  ;;  %v566_v11 = vmax.f32 %v550_v3, 0.0 }
 0x134   : > { %v561_v12 = vmax.f32 %v545_v6, 0.0  ;;  %v569_v13 = vmax.f32 %v553_v7, 0.0  ;;  %v543_v14 = vadd.f32 %v1238_v18, %v520_v8  ;;  %v551_v15 = vadd.f32 %v1238_v18, %v528_v9 }
 0x135   : > { %574 = vst [vmem:[%s1251_s9 + $0x20] sm:$0xff] %v558_v10  ;;  %582 = vst [vmem:[%s1251_s9 + $0x60] sm:$0xff] %v566_v11 }
 0x136   : > { %577 = vst [vmem:[%s1251_s9 + $0x38] sm:$0xff] %v561_v12  ;;  %585 = vst [vmem:[%s1251_s9 + $0x78] sm:$0xff] %v569_v13  ;;  %v559_v16 = vmax.f32 %v543_v14, 0.0  ;;  %v567_v17 = vmax.f32 %v551_v15, 0.0 }
 0x138   : > { %575 = vst [vmem:[%s1251_s9 + $0x28] sm:$0xff] %v559_v16  ;;  %583 = vst [vmem:[%s1251_s9 + $0x68] sm:$0xff] %v567_v17 }
 0x139   : > { %983 = shalt.err (!%p980_p3)
}
 0x13a   : > { %s984_s6 = scalar_lea.hbm %s1292_s29, 2048  ;;  %s988_s27 = scalar_lea.hbm %s1349_s4, 10240 }
 0x13b   : > { %p985_p5 = scmp.ne.s32.totalorder %s1292_s29, %s984_s6  ;;  %p989_p9 = scmp.lt.s32.totalorder %s1292_s29, %s1349_s4 }
 0x13c   : > { %p990_p11 = scmp.lt.s32.totalorder %s988_s27, %s984_s6 }
 0x13d   : > { %p986_p7 = pnand %p985_p5, %p1366_p4 }
 0x13e   : > { %p991_p10 = por %p990_p11, %p989_p9 }
 0x13f   : > { %p987_p6 = pneg %p986_p7 }
 0x141   : > { %p992_p1 = pnand %p991_p10, %p987_p6 }
 0x143   : > { %995 = shalt.err (!%p992_p1)
}
 0x144   : > { %s1061_s9 = smov 128   ;;  %s1062_s10 = smov 8  }
 0x145   : > { %829 = dma.vmem_to_hbm [thread:$0]  (%p1366_p4), %s1294_s24, 2048, %s1292_s29, %s587_s18, %s1061_s9, %s1061_s9, %s1062_s10  }
 0x146 PF: > { %p846_p8 = scmp.ge.s32.totalorder %s1054_s20, 2  ;;  %s616_s14 = sand.u32 1, %s1034_s15  }
 0x147   : > { %p1367_p12 = scmp.ne.s32.totalorder %s1357_s26, 0  ;;  %s617_s11 = scalar_lea.sflag [#allocation4], %s616_s14 }
 0x149   : > { %p840_p13 = pnand %p846_p8, %p1367_p12 }
 0x14b   : > { %p841_p0 = pneg %p840_p13 }
 0x14d   : > { %1029 = dma.done.wait (%p841_p0), %s617_s11, 2048  }
 0x14e   : > { %1031 = vsyncadd (%p841_p0), %s617_s11, 4294965248  ;;  %s21_s20 = sadd.s32 1, %s1054_s20   ;;  %s1368_s15 = smov %s1038_s16 }
 0x14f   : > { %p18_p2 = scmp.ge.s32.totalorder %s21_s20, 7   ;;  %s1369_s16 = smov %s1042_s17 }
 0x150   : > { %s1370_s17 = smov %s1186_s28  ;;  %s1371_s18 = smov %s1050_s19 }
 0x151   : > { %s1372_s19 = smov %s1374_s5  ;;  %20 = sbr.rel (!%p18_p2) target bundleno = 9 (0x9), region = 92 }
 0x156   :  { %622 = vsyncpa [#allocation3], 1 }
 0x157   :  { %624 = vsyncpa [#allocation3 + $0x1], 1 }
 0x158   :  { %625 = vsyncpa [#allocation6], 1 }
 0x159   :  { %626 = vsyncpa [#allocation4], 1 }
 0x15a   :  { %628 = vsyncpa [#allocation4 + $0x1], 1 }

</bundles_post_ra>
